<compile_context>
chip_gen: v6e
topology: v6e:2x2x1
jax: 0.10.0
libtpu: 0.0.40
codegen_flags: <defaults>
</compile_context>

<pallas_src>
import functools

import jax
import jax.numpy as jnp
from jax.experimental import pallas as pl
from jax.experimental.pallas import tpu as pltpu


def _round_up(n, m):
    return ((n + m - 1) // m) * m


def _chip_config():
    """(max batch tile rows, scoped VMEM limit bytes) per TPU generation."""
    try:
        vmem_bytes = int(pltpu.get_tpu_info().vmem_capacity_bytes)
    except Exception:
        vmem_bytes = 64 * 1024 * 1024  # conservative fallback: assume v7x-sized VMEM
    if vmem_bytes >= 96 * 1024 * 1024:
        # v5e / v6e: 128 MiB physical VMEM -> bigger tile, raise scoped limit.
        return 16384, 64 * 1024 * 1024
    # v7x: 64 MiB physical VMEM -> smaller tile, keep default-sized scoped limit.
    return 8192, 32 * 1024 * 1024


def fcv_kernel(x_ref, w0_ref, b0_ref, w1_ref, b1_ref, w2_ref, b2_ref, o_ref):
    # x arrives fp32 straight from HBM; cast to the MXU dtype on the VPU (free - VPU has slack).
    x = x_ref[...].astype(w0_ref.dtype)

    # Layer 0: Linear + ReLU (MXU, fp32 accumulation; bias/ReLU in fp32).
    h0 = jnp.dot(x, w0_ref[...], preferred_element_type=jnp.float32)
    h0 = jnp.maximum(h0 + b0_ref[...], 0.0)

    # Layer 1: Linear + ReLU.
    h1 = jnp.dot(h0.astype(w1_ref.dtype), w1_ref[...],
                 preferred_element_type=jnp.float32)
    h1 = jnp.maximum(h1 + b1_ref[...], 0.0)

    # Layer 2 (value head, single output neuron): VPU multiply + XLU lane-reduce instead of a
    # degenerate N=1 MXU matmul. b2 is an SMEM scalar.
    # NOTE: v[None, :] is a sublane->lane relayout once per step; only worth restructuring
    # (MXU head against padded W2, or batch-on-lanes layout) if XLU shows up in the bundle
    # after any future MXU-packing change.
    w2_row = w2_ref[...].astype(jnp.float32)                    # (1, H)
    v = jnp.sum(h1 * w2_row, axis=-1) + b2_ref[0, 0]            # (TB,)

    # Lane-dense store: output block is (1, TB).
    o_ref[...] = v[None, :].astype(o_ref.dtype)


@functools.partial(jax.jit, static_argnames=("block_b", "compute_dtype"))
def fcv_forward(x, params, *, block_b=None, compute_dtype=jnp.bfloat16):
    """x: (B, D_in) float32. params: (in,out)-layout weights, (1,out) biases.

    Returns (B, 1) float32 state values (same semantics as FCV.forward).
    """
    B, d_in = x.shape
    H = params["w0"].shape[1]

    tb_cap, vmem_limit = _chip_config()
    if block_b is not None:
        tb_cap = block_b
    assert tb_cap % 128 == 0, "batch tile cap must be a multiple of 128 (lane-dense output)"

    if B < 128:
        # Tiny batch: pad up to one 128-row tile (<=120 padded rows, negligible copy).
        # Keeps the x block sublane-aligned and the (1, tb) output store unmasked.
        tb = 128
        b_out = 128
        x_in = jnp.pad(x, ((0, 128 - B), (0, 0)))
    else:
        # Large batch: NO padding / casting passes over x in HBM. At least 2 grid steps so
        # the "parallel" batch axis spans both TensorCores on v7x. The ragged tail block is
        # handled by Pallas partial blocks: out-of-range tail rows read garbage (rows are
        # independent) and their output columns are masked/dropped on store.
        tb = min(tb_cap, _round_up(pl.cdiv(B, 2), 128))
        b_out = B
        x_in = x

    num_tiles = pl.cdiv(b_out, tb)

    # Weights/biases are tiny (<=64x64); casting them here is negligible HBM traffic.
    w0 = params["w0"].astype(compute_dtype)
    w1 = params["w1"].astype(compute_dtype)
    w2 = params["w2"].reshape(1, H).astype(compute_dtype)
    b0 = params["b0"].reshape(1, H).astype(jnp.float32)
    b1 = params["b1"].reshape(1, H).astype(jnp.float32)
    b2 = params["b2"].reshape(1, 1).astype(jnp.float32)

    out = pl.pallas_call(
        fcv_kernel,
        out_shape=jax.ShapeDtypeStruct((1, b_out), jnp.float32),
        grid_spec=pltpu.PrefetchScalarGridSpec(
            num_scalar_prefetch=0,
            grid=(num_tiles,),
            in_specs=[
                pl.BlockSpec((tb, d_in), lambda i: (i, 0)),         # x: fp32, tiled over batch
                pl.BlockSpec((d_in, H), lambda i: (0, 0)),          # w0: VMEM-resident
                pl.BlockSpec((1, H), lambda i: (0, 0)),             # b0
                pl.BlockSpec((H, H), lambda i: (0, 0)),             # w1
                pl.BlockSpec((1, H), lambda i: (0, 0)),             # b1
                pl.BlockSpec((1, H), lambda i: (0, 0)),             # w2 as a (1, H) row
                pl.BlockSpec(memory_space=pltpu.MemorySpace.SMEM),  # b2 scalar
            ],
            out_specs=pl.BlockSpec((1, tb), lambda i: (0, i)),      # lane-dense output
        ),
        compiler_params=pltpu.CompilerParams(
            dimension_semantics=("parallel",),   # megacore sharding on v7x
            vmem_limit_bytes=vmem_limit,
        ),
    )(x_in, w0, b0, w1, b1, w2, b2)

    return out.reshape(b_out, 1)[:B]


def init_fcv_params(key, input_dim, hidden_dims):
    """Deterministic init mimicking PyTorch nn.Linear default:
    U(-1/sqrt(fan_in), 1/sqrt(fan_in)) for both weight and bias."""
    def linear(k, fan_in, fan_out):
        kw, kb = jax.random.split(k)
        bound = 1.0 / jnp.sqrt(jnp.float32(fan_in))
        # stored directly in (in, out) layout (transpose of PyTorch's (out, in))
        w = jax.random.uniform(kw, (fan_in, fan_out), jnp.float32, -bound, bound)
        b = jax.random.uniform(kb, (1, fan_out), jnp.float32, -bound, bound)
        return w, b

    k0, k1, k2 = jax.random.split(key, 3)
    w0, b0 = linear(k0, input_dim, hidden_dims)
    w1, b1 = linear(k1, hidden_dims, hidden_dims)
    w2, b2 = linear(k2, hidden_dims, 1)
    return {"w0": w0, "b0": b0, "w1": w1, "b1": b1, "w2": w2, "b2": b2}


def fcv_reference(x, params, compute_dtype=jnp.float32):
    """Plain-JAX reference. With compute_dtype=bf16 it mirrors the kernel's dtype pipeline
    (bf16 operands, fp32 accumulation); with fp32 it is the exact module."""
    cd = compute_dtype
    w0 = params["w0"].astype(cd)
    w1 = params["w1"].astype(cd)
    w2 = params["w2"].astype(cd).astype(jnp.float32)
    h0 = jnp.maximum(
        jnp.dot(x.astype(cd), w0, preferred_element_type=jnp.float32) + params["b0"], 0.0)
    h1 = jnp.maximum(
        jnp.dot(h0.astype(cd), w1, preferred_element_type=jnp.float32) + params["b1"], 0.0)
    return (jnp.sum(h1 * w2.reshape(1, -1), axis=-1, keepdims=True)
            + params["b2"].reshape(1, 1))


if __name__ == "__main__":
    # Small shapes consistent with the module: n_sensors = 32 pressure sensors,
    # hidden_dims = 64 (the "64x64" critic).
    input_dim, hidden_dims = 32, 64

    key = jax.random.PRNGKey(0)
    kx, kp, kx2 = jax.random.split(key, 3)
    params = init_fcv_params(kp, input_dim, hidden_dims)

    # --- tiny batch: exercises the padded single-tile path (B < 128) ---
    batch = 8
    x = jax.random.normal(kx, (batch, input_dim), jnp.float32)
    out = jax.block_until_ready(fcv_forward(x, params))
    assert out.shape == (batch, 1), out.shape

    ref_matched = fcv_reference(x, params, compute_dtype=jnp.bfloat16)
    assert jnp.allclose(out, ref_matched, atol=1e-3, rtol=1e-3), "mismatch vs matched reference"
    ref_fp32 = fcv_reference(x, params, compute_dtype=jnp.float32)
    assert jnp.allclose(out, ref_fp32, atol=1e-1, rtol=1e-1), "mismatch vs fp32 reference"

    # --- larger batch: exercises the no-pad, multi-step, ragged-tail path ---
    big = 1000   # -> tb = 512, grid = 2, tail block ragged by 24 rows (masked)
    x2 = jax.random.normal(kx2, (big, input_dim), jnp.float32)
    out2 = jax.block_until_ready(fcv_forward(x2, params))
    assert out2.shape == (big, 1), out2.shape
    ref2 = fcv_reference(x2, params, compute_dtype=jnp.bfloat16)
    assert jnp.allclose(out2, ref2, atol=1e-3, rtol=1e-3), "mismatch vs matched reference (ragged)"

    print("KERNEL_OK")
</pallas_src>

<mosaic_0001>
module attributes {stable_mosaic.version = 11 : i64} {
  func.func @fcv_kernel(%arg0: i32, %arg1: memref<128x32xf32, #tpu.memory_space<vmem>>, %arg2: memref<32x64xbf16, #tpu.memory_space<vmem>>, %arg3: memref<1x64xf32, #tpu.memory_space<vmem>>, %arg4: memref<64x64xbf16, #tpu.memory_space<vmem>>, %arg5: memref<1x64xf32, #tpu.memory_space<vmem>>, %arg6: memref<1x64xbf16, #tpu.memory_space<vmem>>, %arg7: memref<1x1xf32, #tpu.memory_space<smem>>, %arg8: memref<1x128xf32, #tpu.memory_space<vmem>>) attributes {dimension_semantics = [#tpu.dimension_semantics<parallel>], iteration_bounds = array<i64: 1>, scalar_prefetch = 0 : i64, scratch_operands = 0 : i64, tpu.core_type = #tpu.core_type<tc>, window_params = [{transform_indices = @transform_0, window_bounds = array<i64: 128, 32>}, {pipeline_mode = #tpu.pipeline_mode<synchronous>, transform_indices = @transform_1, window_bounds = array<i64: 32, 64>}, {pipeline_mode = #tpu.pipeline_mode<synchronous>, transform_indices = @transform_2, window_bounds = array<i64: 1, 64>}, {pipeline_mode = #tpu.pipeline_mode<synchronous>, transform_indices = @transform_3, window_bounds = array<i64: 64, 64>}, {pipeline_mode = #tpu.pipeline_mode<synchronous>, transform_indices = @transform_4, window_bounds = array<i64: 1, 64>}, {pipeline_mode = #tpu.pipeline_mode<synchronous>, transform_indices = @transform_5, window_bounds = array<i64: 1, 64>}, {transform_indices = @transform_6, window_bounds = array<i64: 1, 1>}, {transform_indices = @transform_7, window_bounds = array<i64: 1, 128>}]} {
    %c0 = arith.constant 0 : index
    %c0_0 = arith.constant 0 : index
    %0 = vector.load %arg1[%c0, %c0_0] : memref<128x32xf32, #tpu.memory_space<vmem>>, vector<128x32xf32>
    %1 = arith.truncf %0 : vector<128x32xf32> to vector<128x32xbf16>
    %c0_1 = arith.constant 0 : index
    %c0_2 = arith.constant 0 : index
    %2 = vector.load %arg2[%c0_1, %c0_2] : memref<32x64xbf16, #tpu.memory_space<vmem>>, vector<32x64xbf16>
    %cst = arith.constant dense<0.000000e+00> : vector<128x64xf32>
    %3 = tpu.matmul %1, %2, %cst {dimension_numbers = #tpu.dot_dimension_numbers<[1], [0], [0], [1], [0, 0, 1, 1], [], []>} : vector<128x32xbf16>, vector<32x64xbf16>, vector<128x64xf32> -> vector<128x64xf32>
    %c0_3 = arith.constant 0 : index
    %c0_4 = arith.constant 0 : index
    %4 = vector.load %arg3[%c0_3, %c0_4] : memref<1x64xf32, #tpu.memory_space<vmem>>, vector<1x64xf32>
    %5 = vector.broadcast %4 : vector<1x64xf32> to vector<128x64xf32>
    %6 = arith.addf %3, %5 : vector<128x64xf32>
    %cst_5 = arith.constant 0.000000e+00 : f32
    %7 = vector.broadcast %cst_5 : f32 to vector<128x64xf32>
    %8 = arith.maximumf %6, %7 : vector<128x64xf32>
    %9 = arith.truncf %8 : vector<128x64xf32> to vector<128x64xbf16>
    %c0_6 = arith.constant 0 : index
    %c0_7 = arith.constant 0 : index
    %10 = vector.load %arg4[%c0_6, %c0_7] : memref<64x64xbf16, #tpu.memory_space<vmem>>, vector<64x64xbf16>
    %cst_8 = arith.constant dense<0.000000e+00> : vector<128x64xf32>
    %11 = tpu.matmul %9, %10, %cst_8 {dimension_numbers = #tpu.dot_dimension_numbers<[1], [0], [0], [1], [0, 0, 1, 1], [], []>} : vector<128x64xbf16>, vector<64x64xbf16>, vector<128x64xf32> -> vector<128x64xf32>
    %c0_9 = arith.constant 0 : index
    %c0_10 = arith.constant 0 : index
    %12 = vector.load %arg5[%c0_9, %c0_10] : memref<1x64xf32, #tpu.memory_space<vmem>>, vector<1x64xf32>
    %13 = vector.broadcast %12 : vector<1x64xf32> to vector<128x64xf32>
    %14 = arith.addf %11, %13 : vector<128x64xf32>
    %cst_11 = arith.constant 0.000000e+00 : f32
    %15 = vector.broadcast %cst_11 : f32 to vector<128x64xf32>
    %16 = arith.maximumf %14, %15 : vector<128x64xf32>
    %c0_12 = arith.constant 0 : index
    %c0_13 = arith.constant 0 : index
    %17 = vector.load %arg6[%c0_12, %c0_13] : memref<1x64xbf16, #tpu.memory_space<vmem>>, vector<1x64xbf16>
    %18 = arith.extf %17 : vector<1x64xbf16> to vector<1x64xf32>
    %19 = vector.broadcast %18 : vector<1x64xf32> to vector<128x64xf32>
    %20 = arith.mulf %16, %19 : vector<128x64xf32>
    %cst_14 = arith.constant dense<0.000000e+00> : vector<128xf32>
    %21 = vector.multi_reduction <add>, %20, %cst_14 [1] : vector<128x64xf32> to vector<128xf32>
    %c0_15 = arith.constant 0 : index
    %c0_16 = arith.constant 0 : index
    %22 = memref.load %arg7[%c0_15, %c0_16] : memref<1x1xf32, #tpu.memory_space<smem>>
    %23 = vector.broadcast %22 : f32 to vector<128xf32>
    %24 = arith.addf %21, %23 : vector<128xf32>
    %25 = vector.shape_cast %24 : vector<128xf32> to vector<1x128xf32>
    %c0_17 = arith.constant 0 : index
    %c0_18 = arith.constant 0 : index
    %26 = vector.load %arg8[%c0_17, %c0_18] : memref<1x128xf32, #tpu.memory_space<vmem>>, vector<1x128xf32>
    tpu.vector_store %arg8[%c0_17, %c0_18], %25 {strides = array<i32>} : memref<1x128xf32, #tpu.memory_space<vmem>>, vector<1x128xf32>,
    return
  }
  func.func @transform_0(%arg0: i32) -> (i32, i32) {
    %c0_i32 = arith.constant 0 : i32
    %c0_i32_0 = arith.constant 0 : i32
    return %arg0, %c0_i32 : i32, i32
  }
  func.func @transform_1(%arg0: i32) -> (i32, i32) {
    %c0_i32 = arith.constant 0 : i32
    %c0_i32_0 = arith.constant 0 : i32
    %c0_i32_1 = arith.constant 0 : i32
    return %c0_i32, %c0_i32_0 : i32, i32
  }
  func.func @transform_2(%arg0: i32) -> (i32, i32) {
    %c0_i32 = arith.constant 0 : i32
    %c0_i32_0 = arith.constant 0 : i32
    %c0_i32_1 = arith.constant 0 : i32
    return %c0_i32, %c0_i32_0 : i32, i32
  }
  func.func @transform_3(%arg0: i32) -> (i32, i32) {
    %c0_i32 = arith.constant 0 : i32
    %c0_i32_0 = arith.constant 0 : i32
    %c0_i32_1 = arith.constant 0 : i32
    return %c0_i32, %c0_i32_0 : i32, i32
  }
  func.func @transform_4(%arg0: i32) -> (i32, i32) {
    %c0_i32 = arith.constant 0 : i32
    %c0_i32_0 = arith.constant 0 : i32
    %c0_i32_1 = arith.constant 0 : i32
    return %c0_i32, %c0_i32_0 : i32, i32
  }
  func.func @transform_5(%arg0: i32) -> (i32, i32) {
    %c0_i32 = arith.constant 0 : i32
    %c0_i32_0 = arith.constant 0 : i32
    %c0_i32_1 = arith.constant 0 : i32
    return %c0_i32, %c0_i32_0 : i32, i32
  }
  func.func @transform_6(%arg0: i32) -> (i32, i32) {
    %c0_i32 = arith.constant 0 : i32
    %c0_i32_0 = arith.constant 0 : i32
    %c0_i32_1 = arith.constant 0 : i32
    return %c0_i32, %c0_i32_0 : i32, i32
  }
  func.func @transform_7(%arg0: i32) -> (i32, i32) {
    %c0_i32 = arith.constant 0 : i32
    %c0_i32_0 = arith.constant 0 : i32
    return %c0_i32, %arg0 : i32, i32
  }
}

</mosaic_0001>

<bundles_post_ra>
// kernel: fcv_forward.1
= control target key start
LH: loop header
LB: loop body
LE: loop exit
PB: predicated region body
PF: predicated region fallthrough
CT: control target
= control target key end

     0   :  { %vm75_vm0 = vcmask 261120   ;;  %vm260_vm1 = vcmask 523264   ;;  %vm513_vm2 = vcmask 130112   ;;  %vm520_vm3 = vcmask 195712   ;;  %s961_s1 = inlined_call_operand.vmem [shape: bf16[32,64], index: 1, kind: input, shape index: {}]   ;;  %s962_s0 = inlined_call_operand.vmem [shape: f32[128,32], index: 0, kind: input, shape index: {}]   ;;  %s963_s3 = inlined_call_operand.vmem [shape: bf16[64,64], index: 3, kind: input, shape index: {}]   ;;  %s964_s2 = inlined_call_operand.vmem [shape: f32[1,64], index: 2, kind: input, shape index: {}]   ;;  %s965_s5 = inlined_call_operand.vmem [shape: bf16[1,64], index: 5, kind: input, shape index: {}]   ;;  %s966_s4 = inlined_call_operand.vmem [shape: f32[1,64], index: 4, kind: input, shape index: {}]   ;;  %s967_s6 = inlined_call_operand.<no memory space> [shape: f32[1,1], index: 6, kind: input, shape index: {}]   ;;  %s968_s7 = inlined_call_operand.vmem [shape: f32[1,128], index: 7, kind: output, shape index: {}]  }
   0x1   :  { %v709_v0 = vld [vmem:[%s961_s1 + $0x8] sm:$0xff]   ;;  %v710_v1 = vld [vmem:[%s961_s1] sm:$0xff]   ;;  %v30_v5 = vld [vmem:[%s962_s0 + $0x10] sm:$0xff]  ;;  %vm527_vm4 = vcmask 261312   ;;  %vm534_vm5 = vcmask 326912   ;;  %vm541_vm6 = vcmask 392512  }
   0x2   :  { %665 = vmatprep.subr.bf16.mxu0 %v709_v0  ;;  %v28_v2 = vld [vmem:[%s962_s0] sm:$0xff]  ;;  %v29_v3 = vld [vmem:[%s962_s0 + $0x8] sm:$0xff]  ;;  %v31_v6 = vld [vmem:[%s962_s0 + $0x18] sm:$0xff]  ;;  %vm548_vm7 = vcmask 458112   ;;  %vm555_vm8 = vcmask 523712   ;;  %vm562_vm9 = vcmask 589312  }
   0x3   :  { %666 = vmatpush3.bf16.msra.mxu0 %v709_v0  ;;  %v44_v4 = vpack.c.bf16 %v29_v3, %v28_v2  ;;  %v32_v7 = vld [vmem:[%s962_s0 + $0x20] sm:$0xff]  ;;  %v33_v8 = vld [vmem:[%s962_s0 + $0x28] sm:$0xff]  ;;  %v45_v9 = vpack.c.bf16 %v31_v6, %v30_v5  ;;  %v711_v11 = vld [vmem:[%s963_s3 + $0x18] sm:$0xff]   ;;  %vm569_vm10 = vcmask 654912   ;;  %vm576_vm11 = vcmask 720512  }
   0x4   :  { %667 = vmatprep.subr.bf16.mxu0 %v710_v1  ;;  %v46_v10 = vpack.c.bf16 %v33_v8, %v32_v7  ;;  %685 = vmatprep.subr.bf16.mxu1 %v711_v11  ;;  %v34_v12 = vld [vmem:[%s962_s0 + $0x30] sm:$0xff]  ;;  %v35_v13 = vld [vmem:[%s962_s0 + $0x38] sm:$0xff]  ;;  %v36_v14 = vld [vmem:[%s962_s0 + $0x40] sm:$0xff]  ;;  %vm583_vm12 = vcmask 786112   ;;  %vm590_vm13 = vcmask 851712   ;;  %vm597_vm14 = vcmask 917312  }
   0x5   :  { %669 = vmatprep.mubr.msk.bf16.mxu0 %vm75_vm0, %v44_v4  ;;  %686 = vmatpush3.bf16.msra.mxu1 %v711_v11  ;;  %v37_v15 = vld [vmem:[%s962_s0 + $0x48] sm:$0xff]  ;;  %v47_v16 = vpack.c.bf16 %v35_v13, %v34_v12  ;;  %v38_v18 = vld [vmem:[%s962_s0 + $0x50] sm:$0xff]  ;;  %v39_v19 = vld [vmem:[%s962_s0 + $0x58] sm:$0xff]  ;;  %vm604_vm15 = vcmask 982912  }
   0x6   :  { %v48_v17 = vpack.c.bf16 %v37_v15, %v36_v14  ;;  %v40_v20 = vld [vmem:[%s962_s0 + $0x60] sm:$0xff]  ;;  %v41_v21 = vld [vmem:[%s962_s0 + $0x68] sm:$0xff]  ;;  %v49_v22 = vpack.c.bf16 %v39_v19, %v38_v18  ;;  %v42_v24 = vld [vmem:[%s962_s0 + $0x70] sm:$0xff] }
   0x7   :  { %668 = vmatpush3.bf16.msra.mxu0 %v710_v1  ;;  %v50_v23 = vpack.c.bf16 %v41_v21, %v40_v20  ;;  %v43_v25 = vld [vmem:[%s962_s0 + $0x78] sm:$0xff]  ;;  %v712_v27 = vld [vmem:[%s963_s3 + $0x10] sm:$0xff]   ;;  %v713_v28 = vld [vmem:[%s963_s3 + $0x8] sm:$0xff]  }
   0x8   :  { %v51_v26 = vpack.c.bf16 %v43_v25, %v42_v24  ;;  %687 = vmatprep.subr.bf16.mxu1 %v712_v27  ;;  %v714_v29 = vld [vmem:[%s963_s3] sm:$0xff]  }
   0x9   :  { %688 = vmatpush3.bf16.msra.mxu1 %v712_v27  ;;  %v619_v32 = vld [vmem:[%s964_s2] ss:$0 sm:$0xff] }
   0xa   :  { %670 = vmatmul.mubr.msk.bf16.vlgmr.msra.gmra.mxu0 %vm75_vm0, %v45_v9  ;;  %689 = vmatprep.subr.bf16.mxu1 %v713_v28  ;;  %v398_v25 = vld [vmem:[%s965_s5] sm:$0x1] }
   0xb   :  { %673 = vmatprep.mubr.msk.bf16.mxu0 %vm75_vm0, %v46_v10 }
   0xd   :  { %690 = vmatpush3.bf16.msra.mxu1 %v713_v28  ;;  %v850_v28 = vld [vmem:[%s966_s4] ss:$0 sm:$0xff] }
   0xe   :  { %691 = vmatprep.subr.bf16.mxu1 %v714_v29 }
  0x11   :  { %692 = vmatpush3.bf16.msra.mxu1 %v714_v29 }
  0x12   :  { %674 = vmatmul.mubr.msk.bf16.gmra.mxu0 %vm75_vm0, %v47_v16 }
  0x13   :  { %677 = vmatprep.mubr.msk.bf16.mxu0 %vm75_vm0, %v48_v17 }
  0x1a   :  { %678 = vmatmul.mubr.msk.bf16.gmra.mxu0 %vm75_vm0, %v49_v22 }
  0x1b   :  { %681 = vmatprep.mubr.msk.bf16.mxu0 %vm75_vm0, %v50_v23  ;;  %v400_v23 = vlaneseq }
  0x1d   :  { %v841_v24 = vshrl.u32 %v400_v23, 7 }
  0x1f   :  { %v402_v27 = vsub.s32 0, %v841_v24 }
  0x22   :  { %682 = vmatmul.mubr.msk.bf16.gmra.mxu0 %vm75_vm0, %v51_v26  ;;  %v399_v26 = vunpack.c.l.bf16 %v398_v25  ;;  %vm611_vm0 = vcmask 1048512  }
  0xca   :  { %v671_v30 = vpop.f32.mrf.mxu0 }
  0xcb   :  { %v143_v36 = vadd.f32 %v671_v30, %v619_v32 }
  0xcc   :  { %v134_v31 = vpop.f32.mrf.mxu0 }
  0xcd   :  { %v135_v34 = vadd.f32 %v619_v32, %v134_v31  ;;  %v199_v43 = vmax.f32 %v143_v36, 0.0  ;;  %v853_v31 = vrot.slane %v399_v26, %v402_v27 }
  0xce   :  { %v672_v33 = vpop.f32.mrf.mxu0 }
  0xcf   :  { %v146_v35 = vadd.f32 %v672_v33, %v619_v32  ;;  %v197_v41 = vmax.f32 %v135_v34, 0.0 }
  0xd0   :  { %v137_v37 = vpop.f32.mrf.mxu0 }
  0xd1   :  { %v138_v38 = vadd.f32 %v619_v32, %v137_v37  ;;  %v200_v39 = vmax.f32 %v146_v35, 0.0 }
  0xd2   :  { %v675_v40 = vpop.f32.mrf.mxu0 }
  0xd3   :  { %v198_v42 = vmax.f32 %v138_v38, 0.0  ;;  %v214_v46 = vpack.c.bf16 %v200_v39, %v199_v43  ;;  %v159_v50 = vadd.f32 %v675_v40, %v619_v32 }
  0xd4   :  { %v150_v44 = vpop.f32.mrf.mxu0 }
  0xd5   :  { %v213_v45 = vpack.c.bf16 %v198_v42, %v197_v41  ;;  %v151_v48 = vadd.f32 %v619_v32, %v150_v44  ;;  %v203_v57 = vmax.f32 %v159_v50, 0.0 }
  0xd6   :  { %v676_v47 = vpop.f32.mrf.mxu0 }
  0xd7   :  { %v162_v49 = vadd.f32 %v676_v47, %v619_v32  ;;  %693 = vmatprep.mubr.msk.bf16.mxu1 %vm260_vm1, %v213_v45  ;;  %v201_v55 = vmax.f32 %v151_v48, 0.0 }
  0xd8   :  { %v153_v51 = vpop.f32.mrf.mxu0  ;;  %694 = vmatmul.mubr.msk.bf16.vlgmr.msra.gmra.mxu1 %vm260_vm1, %v214_v46 }
  0xd9   :  { %v154_v52 = vadd.f32 %v619_v32, %v153_v51  ;;  %v204_v53 = vmax.f32 %v162_v49, 0.0 }
  0xda   :  { %v679_v54 = vpop.f32.mrf.mxu0 }
  0xdb   :  { %v202_v56 = vmax.f32 %v154_v52, 0.0  ;;  %v216_v60 = vpack.c.bf16 %v204_v53, %v203_v57  ;;  %v175_v0 = vadd.f32 %v679_v54, %v619_v32 }
  0xdc   :  { %v166_v58 = vpop.f32.mrf.mxu0 }
  0xdd   :  { %v215_v59 = vpack.c.bf16 %v202_v56, %v201_v55  ;;  %v167_v62 = vadd.f32 %v619_v32, %v166_v58  ;;  %v207_v7 = vmax.f32 %v175_v0, 0.0 }
  0xde   :  { %v680_v61 = vpop.f32.mrf.mxu0 }
  0xdf   :  { %v178_v63 = vadd.f32 %v680_v61, %v619_v32  ;;  %697 = vmatprep.mubr.msk.bf16.mxu1 %vm260_vm1, %v215_v59  ;;  %v205_v5 = vmax.f32 %v167_v62, 0.0 }
  0xe0   :  { %v169_v1 = vpop.f32.mrf.mxu0  ;;  %698 = vmatmul.mubr.msk.bf16.gmra.mxu1 %vm260_vm1, %v216_v60 }
  0xe1   :  { %v170_v2 = vadd.f32 %v619_v32, %v169_v1  ;;  %v208_v3 = vmax.f32 %v178_v63, 0.0 }
  0xe2   :  { %v683_v4 = vpop.f32.mrf.mxu0 }
  0xe3   :  { %v206_v6 = vmax.f32 %v170_v2, 0.0  ;;  %v218_v10 = vpack.c.bf16 %v208_v3, %v207_v7  ;;  %v191_v14 = vadd.f32 %v683_v4, %v619_v32 }
  0xe4   :  { %v182_v8 = vpop.f32.mrf.mxu0 }
  0xe5   :  { %v217_v9 = vpack.c.bf16 %v206_v6, %v205_v5  ;;  %v183_v12 = vadd.f32 %v619_v32, %v182_v8  ;;  %v211_v20 = vmax.f32 %v191_v14, 0.0 }
  0xe6   :  { %v684_v11 = vpop.f32.mrf.mxu0 }
  0xe7   :  { %v194_v13 = vadd.f32 %v684_v11, %v619_v32  ;;  %701 = vmatprep.mubr.msk.bf16.mxu1 %vm260_vm1, %v217_v9  ;;  %v209_v18 = vmax.f32 %v183_v12, 0.0 }
  0xe8   :  { %v185_v15 = vpop.f32.mrf.mxu0  ;;  %702 = vmatmul.mubr.msk.bf16.gmra.mxu1 %vm260_vm1, %v218_v10 }
  0xe9   :  { %v186_v16 = vadd.f32 %v619_v32, %v185_v15  ;;  %v212_v17 = vmax.f32 %v194_v13, 0.0 }
  0xeb   :  { %v210_v19 = vmax.f32 %v186_v16, 0.0  ;;  %v220_v22 = vpack.c.bf16 %v212_v17, %v211_v20 }
  0xed   :  { %v219_v21 = vpack.c.bf16 %v210_v19, %v209_v18 }
  0xef   :  { %705 = vmatprep.mubr.msk.bf16.mxu1 %vm260_vm1, %v219_v21 }
  0xf0   :  { %706 = vmatmul.mubr.msk.bf16.gmra.mxu1 %vm260_vm1, %v220_v22 }
 0x198   :  { %v695_v29 = vpop.f32.mrf.mxu1 }
 0x199   :  { %v328_v30 = vadd.f32 %v695_v29, %v850_v28 }
 0x19a   :  { %v319_v32 = vpop.f32.mrf.mxu1 }
 0x19b   :  { %v384_v33 = vmax.f32 %v328_v30, 0.0  ;;  %v320_v34 = vadd.f32 %v850_v28, %v319_v32 }
 0x19c   :  { %v696_v35 = vpop.f32.mrf.mxu1 }
 0x19d   :  { %v382_v36 = vmax.f32 %v320_v34, 0.0  ;;  %v331_v37 = vadd.f32 %v696_v35, %v850_v28  ;;  %v406_v38 = vmul.f32 %v853_v31, %v384_v33 }
 0x19e   :  { %v322_v39 = vpop.f32.mrf.mxu1 }
 0x19f   :  { %v385_v40 = vmax.f32 %v331_v37, 0.0  ;;  %v323_v41 = vadd.f32 %v850_v28, %v322_v39  ;;  %v426_v42 = vsel %vm260_vm1, %v406_v38, 0.0  ;;  %v404_v43 = vmul.f32 %v853_v31, %v382_v36 }
 0x1a0   :  { %427 = vadd.xlane.f32.xlu1 %v426_v42  ;;  %v699_v44 = vpop.f32.mrf.mxu1 }
 0x1a1   :  { %v383_v45 = vmax.f32 %v323_v41, 0.0  ;;  %v344_v46 = vadd.f32 %v699_v44, %v850_v28  ;;  %v420_v47 = vsel %vm260_vm1, %v404_v43, 0.0  ;;  %v407_v48 = vmul.f32 %v853_v31, %v385_v40 }
 0x1a2   :  { %v335_v49 = vpop.f32.mrf.mxu1  ;;  %421 = vadd.xlane.f32.xlu0 %v420_v47 }
 0x1a3   :  { %v388_v50 = vmax.f32 %v344_v46, 0.0  ;;  %v336_v51 = vadd.f32 %v850_v28, %v335_v49  ;;  %v429_v52 = vsel %vm260_vm1, %v407_v48, 0.0  ;;  %v405_v53 = vmul.f32 %v853_v31, %v383_v45 }
 0x1a4   :  { %430 = vadd.xlane.f32.xlu1 %v429_v52  ;;  %v700_v54 = vpop.f32.mrf.mxu1  ;;  %v903_v49 = vand.u32 127, %v400_v23 }
 0x1a5   :  { %v386_v55 = vmax.f32 %v336_v51, 0.0  ;;  %v347_v56 = vadd.f32 %v700_v54, %v850_v28  ;;  %v423_v57 = vsel %vm260_vm1, %v405_v53, 0.0  ;;  %v410_v58 = vmul.f32 %v853_v31, %v388_v50 }
 0x1a6   :  { %v338_v59 = vpop.f32.mrf.mxu1  ;;  %424 = vadd.xlane.f32.xlu0 %v423_v57  ;;  %v508_v50 = vadd.s32 4294967288, %v903_v49  ;;  %v515_v53 = vadd.s32 4294967280, %v903_v49  ;;  %v910_v54 = vstv %s967_s6  ;;  %v522_v57 = vadd.s32 4294967272, %v903_v49 }
 0x1a7   :  { %v389_v60 = vmax.f32 %v347_v56, 0.0  ;;  %v339_v61 = vadd.f32 %v850_v28, %v338_v59  ;;  %v438_v63 = vsel %vm260_vm1, %v410_v58, 0.0  ;;  %v408_v3 = vmul.f32 %v853_v31, %v386_v55 }
 0x1a8   :  { %v703_v62 = vpop.f32.mrf.mxu1  ;;  %v506_v55 = vsub.s32 %v903_v49, %v841_v24  ;;  %v518_v59 = vsub.s32 %v515_v53, %v841_v24 }
 0x1a9   :  { %v387_v0 = vmax.f32 %v339_v61, 0.0  ;;  %v360_v1 = vadd.f32 %v703_v62, %v850_v28  ;;  %v411_v2 = vmul.f32 %v853_v31, %v389_v60  ;;  %v432_v12 = vsel %vm260_vm1, %v408_v3, 0.0 }
 0x1aa   :  { %v351_v4 = vpop.f32.mrf.mxu1  ;;  %439 = vadd.xlane.f32.xlu0 %v438_v63  ;;  %v529_v63 = vadd.s32 4294967264, %v903_v49  ;;  %v536_v3 = vadd.s32 4294967256, %v903_v49 }
 0x1ab   :  { %v392_v5 = vmax.f32 %v360_v1, 0.0  ;;  %v352_v6 = vadd.f32 %v850_v28, %v351_v4  ;;  %v441_v7 = vsel %vm260_vm1, %v411_v2, 0.0  ;;  %v409_v8 = vmul.f32 %v853_v31, %v387_v0 }
 0x1ac   :  { %442 = vadd.xlane.f32.xlu1 %v441_v7  ;;  %v704_v9 = vpop.f32.mrf.mxu1  ;;  %v525_v2 = vsub.s32 %v522_v57, %v841_v24 }
 0x1ad   :  { %v390_v10 = vmax.f32 %v352_v6, 0.0  ;;  %v363_v11 = vadd.f32 %v704_v9, %v850_v28  ;;  %v414_v13 = vmul.f32 %v853_v31, %v392_v5  ;;  %v435_v17 = vsel %vm260_vm1, %v409_v8, 0.0 }
 0x1ae   :  { %v354_v14 = vpop.f32.mrf.mxu1  ;;  %433 = vadd.xlane.f32.xlu0 %v432_v12  ;;  %v543_v6 = vadd.s32 4294967248, %v903_v49  ;;  %v532_v9 = vsub.s32 %v529_v63, %v841_v24  ;;  %v606_v63 = vadd.s32 4294967176, %v903_v49 }
 0x1af   :  { %v393_v15 = vmax.f32 %v363_v11, 0.0  ;;  %v355_v16 = vadd.f32 %v850_v28, %v354_v14  ;;  %v450_v19 = vsel %vm260_vm1, %v414_v13, 0.0  ;;  %v412_v25 = vmul.f32 %v853_v31, %v390_v10 }
 0x1b0   :  { %v707_v18 = vpop.f32.mrf.mxu1  ;;  %436 = vadd.xlane.f32.xlu1 %v435_v17  ;;  %v539_v13 = vsub.s32 %v536_v3, %v841_v24 }
 0x1b1   :  { %v391_v20 = vmax.f32 %v355_v16, 0.0  ;;  %v376_v21 = vadd.f32 %v707_v18, %v850_v28  ;;  %v415_v22 = vmul.f32 %v853_v31, %v393_v15  ;;  %v444_v36 = vsel %vm260_vm1, %v412_v25, 0.0 }
 0x1b2   :  { %v367_v26 = vpop.f32.mrf.mxu1  ;;  %451 = vadd.xlane.f32.xlu0 %v450_v19  ;;  %v546_v15 = vsub.s32 %v543_v6, %v841_v24  ;;  %v550_v16 = vadd.s32 4294967240, %v903_v49  ;;  %v571_v25 = vadd.s32 4294967216, %v903_v49 }
 0x1b3   :  { %v368_v27 = vadd.f32 %v850_v28, %v367_v26  ;;  %v453_v29 = vsel %vm260_vm1, %v415_v22, 0.0  ;;  %v413_v30 = vmul.f32 %v853_v31, %v391_v20  ;;  %v396_v33 = vmax.f32 %v376_v21, 0.0 }
 0x1b4   :  { %v708_v32 = vpop.f32.mrf.mxu1  ;;  %454 = vadd.xlane.f32.xlu1 %v453_v29  ;;  %v557_v21 = vadd.s32 4294967232, %v903_v49 }
 0x1b5   :  { %v394_v34 = vmax.f32 %v368_v27, 0.0  ;;  %v379_v35 = vadd.f32 %v708_v32, %v850_v28  ;;  %v447_v39 = vsel %vm260_vm1, %v413_v30, 0.0  ;;  %v418_v44 = vmul.f32 %v853_v31, %v396_v33 }
 0x1b6   :  { %v370_v37 = vpop.f32.mrf.mxu1  ;;  %445 = vadd.xlane.f32.xlu0 %v444_v36  ;;  %v564_v30 = vadd.s32 4294967224, %v903_v49  ;;  %v553_v32 = vsub.s32 %v550_v16, %v841_v24 }
 0x1b7   :  { %v371_v38 = vadd.f32 %v850_v28, %v370_v37  ;;  %v416_v40 = vmul.f32 %v853_v31, %v394_v34  ;;  %v397_v41 = vmax.f32 %v379_v35, 0.0  ;;  %v462_v47 = vsel %vm260_vm1, %v418_v44, 0.0 }
 0x1b8   :  { %448 = vadd.xlane.f32.xlu1 %v447_v39  ;;  %v578_v34 = vadd.s32 4294967208, %v903_v49  ;;  %v574_v39 = vsub.s32 %v571_v25, %v841_v24  ;;  %v567_v44 = vsub.s32 %v564_v30, %v841_v24 }
 0x1b9   :  { %v395_v42 = vmax.f32 %v371_v38, 0.0  ;;  %v456_v43 = vsel %vm260_vm1, %v416_v40, 0.0  ;;  %v419_v28 = vmul.f32 %v853_v31, %v397_v41  ;;  %v560_v38 = vsub.s32 %v557_v21, %v841_v24 }
 0x1ba   :  { %457 = vadd.xlane.f32.xlu0 %v456_v43  ;;  %v585_v41 = vadd.s32 4294967200, %v903_v49 }
 0x1bb   :  { %v417_v45 = vmul.f32 %v853_v31, %v395_v42  ;;  %v465_v48 = vsel %vm260_vm1, %v419_v28, 0.0  ;;  %v511_v31 = vsub.s32 %v508_v50, %v841_v24 }
 0x1bd   :  { %v459_v46 = vsel %vm260_vm1, %v417_v45, 0.0 }
 0x1be   :  { %460 = vadd.xlane.f32.xlu1 %v459_v46  ;;  %463 = vadd.xlane.f32.xlu0 %v462_v47  ;;  %v581_v47 = vsub.s32 %v578_v34, %v841_v24 }
 0x1c2   :  { %466 = vadd.xlane.f32.xlu1 %v465_v48 }
 0x229   :  { %v428_v51 = vpop.xlane.xlu1 %427 }
 0x22a   :  { %v472_v61 = vadd.f32 %v910_v54, %v428_v51 }
 0x22b   :  { %v422_v52 = vpop.xlane.xlu0 %421 }
 0x22c   :  { %v470_v56 = vadd.f32 %v910_v54, %v422_v52  ;;  %v519_v8 = vrot.slane %v472_v61, %v518_v59  ;;  %v592_v52 = vadd.s32 4294967192, %v903_v49 }
 0x22d   :  { %v431_v60 = vpop.xlane.xlu1 %430 }
 0x22e   :  { %v507_v0 = vrot.slane %v470_v56, %v506_v55  ;;  %v473_v4 = vadd.f32 %v910_v54, %v431_v60  ;;  %v599_v56 = vadd.s32 4294967184, %v903_v49 }
 0x22f   :  { %v425_v23 = vpop.xlane.xlu0 %424 }
 0x230   :  { %v471_v58 = vadd.f32 %v910_v54, %v425_v23  ;;  %v526_v14 = vrot.slane %v473_v4, %v525_v2  ;;  %v602_v3 = vsub.s32 %v599_v56, %v841_v24 }
 0x232   :  { %v512_v62 = vrot.slane %v471_v58, %v511_v31  ;;  %v588_v31 = vsub.s32 %v585_v41, %v841_v24 }
 0x233   :  { %v440_v1 = vpop.xlane.xlu0 %439 }
 0x234   :  { %v514_v5 = vsel %vm513_vm2, %v512_v62, %v507_v0  ;;  %v476_v18 = vadd.f32 %v910_v54, %v440_v1  ;;  %v595_v62 = vsub.s32 %v592_v52, %v841_v24 }
 0x235   :  { %v443_v7 = vpop.xlane.xlu1 %442  ;;  %v521_v11 = vsel %vm520_vm3, %v519_v8, %v514_v5 }
 0x236   :  { %v528_v22 = vsel %vm527_vm4, %v526_v14, %v521_v11  ;;  %v477_v33 = vadd.f32 %v910_v54, %v443_v7  ;;  %v547_v36 = vrot.slane %v476_v18, %v546_v15 }
 0x237   :  { %v434_v10 = vpop.xlane.xlu0 %433 }
 0x238   :  { %v474_v12 = vadd.f32 %v910_v54, %v434_v10  ;;  %v554_v45 = vrot.slane %v477_v33, %v553_v32 }
 0x239   :  { %v437_v17 = vpop.xlane.xlu1 %436 }
 0x23a   :  { %v533_v19 = vrot.slane %v474_v12, %v532_v9  ;;  %v475_v20 = vadd.f32 %v910_v54, %v437_v17  ;;  %v609_v9 = vsub.s32 %v606_v63, %v841_v24 }
 0x23b   :  { %v452_v26 = vpop.xlane.xlu0 %451 }
 0x23c   :  { %v535_v27 = vsel %vm534_vm5, %v533_v19, %v528_v22  ;;  %v540_v29 = vrot.slane %v475_v20, %v539_v13  ;;  %v480_v46 = vadd.f32 %v910_v54, %v452_v26 }
 0x23d   :  { %v455_v35 = vpop.xlane.xlu1 %454 }
 0x23e   :  { %v542_v37 = vsel %vm541_vm6, %v540_v29, %v535_v27  ;;  %v481_v48 = vadd.f32 %v910_v54, %v455_v35  ;;  %v575_v59 = vrot.slane %v480_v46, %v574_v39 }
 0x23f   :  { %v446_v40 = vpop.xlane.xlu0 %445  ;;  %v549_v42 = vsel %vm548_vm7, %v547_v36, %v542_v37 }
 0x240   :  { %v478_v43 = vadd.f32 %v910_v54, %v446_v40  ;;  %v556_v53 = vsel %vm555_vm8, %v554_v45, %v549_v42  ;;  %v582_v60 = vrot.slane %v481_v48, %v581_v47 }
 0x241   :  { %v449_v28 = vpop.xlane.xlu1 %448 }
 0x242   :  { %v561_v50 = vrot.slane %v478_v43, %v560_v38  ;;  %v479_v51 = vadd.f32 %v910_v54, %v449_v28 }
 0x243   :  { %v458_v55 = vpop.xlane.xlu0 %457 }
 0x244   :  { %v563_v23 = vsel %vm562_vm9, %v561_v50, %v556_v53  ;;  %v568_v57 = vrot.slane %v479_v51, %v567_v44  ;;  %v482_v58 = vadd.f32 %v910_v54, %v458_v55 }
 0x246   :  { %v570_v61 = vsel %vm569_vm10, %v568_v57, %v563_v23  ;;  %v589_v1 = vrot.slane %v482_v58, %v588_v31 }
 0x247   :  { %v577_v0 = vsel %vm576_vm11, %v575_v59, %v570_v61  ;;  %v461_v2 = vpop.xlane.xlu1 %460  ;;  %v464_v4 = vpop.xlane.xlu0 %463 }
 0x248   :  { %v584_v5 = vsel %vm583_vm12, %v582_v60, %v577_v0  ;;  %v483_v6 = vadd.f32 %v910_v54, %v461_v2  ;;  %v484_v7 = vadd.f32 %v910_v54, %v464_v4 }
 0x249   :  { %v591_v10 = vsel %vm590_vm13, %v589_v1, %v584_v5 }
 0x24a   :  { %v596_v8 = vrot.slane %v483_v6, %v595_v62  ;;  %v603_v11 = vrot.slane %v484_v7, %v602_v3 }
 0x24b   :  { %v467_v12 = vpop.xlane.xlu1 %466 }
 0x24c   :  { %v598_v49 = vsel %vm597_vm14, %v596_v8, %v591_v10  ;;  %v485_v13 = vadd.f32 %v910_v54, %v467_v12 }
 0x24d   :  { %v605_v15 = vsel %vm604_vm15, %v603_v11, %v598_v49 }
 0x24e   :  { %v610_v14 = vrot.slane %v485_v13, %v609_v9 }
 0x250   :  { %v612_v16 = vsel %vm611_vm0, %v610_v14, %v605_v15 }
 0x251   :  { %614 = vst [vmem:[%s968_s7] sm:$0x1] %v612_v16 }

</bundles_post_ra>
